<compile_context>
chip_gen: v5e
topology: v5e:2x2
jax: 0.10.0
libtpu: 0.0.40
codegen_flags: <defaults>
</compile_context>

<pallas_src>
import jax
import jax.numpy as jnp
from jax.experimental import pallas as pl
from jax.experimental.pallas import tpu as pltpu


def _self_attend_kernel(x_ref, bias_ref, w1_ref, b1_ref, w2_ref, o_ref):
    # x_ref:    (TB, S, E)  block of batch rows
    # bias_ref: (TB, S)     additive mask bias (0 = keep, -1e9 = masked)
    # w1_ref:   (E, H)      h1 weight (x @ W layout)
    # b1_ref:   (1, H)
    # w2_ref:   (1, H)      gate_layer weight as a row
    # o_ref:    (TB, E)
    TB, S, E = x_ref.shape
    H = w1_ref.shape[1]

    x = x_ref[...]                                    # [TB, S, E]
    x2 = x.reshape(TB * S, E)                         # merge batch+seq (layout no-op)

    # h1: Linear(E, H) + tanh — single MXU matmul over all fused rows, f32 accum.
    h = jnp.tanh(
        jnp.dot(x2, w1_ref[...], preferred_element_type=jnp.float32)
        + b1_ref[...]
    )                                                 # [TB*S, H]

    # gate_layer: H -> 1 projection as VPU mul + lane reduce (no width-1 MXU pass).
    h3 = h.reshape(TB, S, H)                          # split rows back (layout no-op)
    gates = jnp.sum(h3 * w2_ref[...].reshape(1, 1, H), axis=-1)   # [TB, S]

    # masked_fill(mask == 0, -1e9) folded into a single additive bias.
    gates = gates + bias_ref[...]                     # [TB, S], seq on the lane axis

    # softmax over the sequence axis (lane-axis reduces).
    g_max = jnp.max(gates, axis=-1, keepdims=True)
    p = jnp.exp(gates - g_max)
    p = p * pl.reciprocal(jnp.sum(p, axis=-1, keepdims=True), approx=False)  # [TB, S]

    # weighted sum over seq as a batched MXU contraction: [TB,1,S] @ [TB,S,E].
    out = jnp.einsum(
        "bqs,bse->bqe", p[:, None, :], x, preferred_element_type=jnp.float32
    )                                                 # [TB, 1, E]
    o_ref[...] = out.reshape(TB, E).astype(o_ref.dtype)


def self_attend(seqs, w1, b1, w2, b2=None, seq_masks=None, block_b=None):
    """seqs: [B, S, E]; w1: [E, H]; b1: [H]; w2: [H, 1]; seq_masks: [B, S] (0 = masked).

    `b2` is accepted for API parity with the PyTorch module but intentionally
    unused: softmax is shift-invariant, so adding a scalar to every gate is a
    no-op on the output.
    """
    B, S, E = seqs.shape
    H = w1.shape[1]

    # Precompute the additive mask bias once in the wrapper.
    if seq_masks is None:
        bias = jnp.zeros((B, S), dtype=jnp.float32)
    else:
        bias = jnp.where(seq_masks == 0, jnp.float32(-1e9), jnp.float32(0.0))

    # Block multiple batch rows per grid step; keep >= 2 parallel chunks so a
    # v7x chip can shard across both TensorCores.
    if block_b is None:
        block_b = B if B < 2 else pl.cdiv(B, 2)
    nb = pl.cdiv(B, block_b)
    Bp = nb * block_b
    if Bp != B:
        seqs = jnp.pad(seqs, ((0, Bp - B), (0, 0), (0, 0)))
        bias = jnp.pad(bias, ((0, Bp - B), (0, 0)))

    b1_2d = b1.reshape(1, H)
    w2_row = w2.reshape(1, H)   # (H, 1) -> (1, H) row for the lane reduce

    out = pl.pallas_call(
        _self_attend_kernel,
        out_shape=jax.ShapeDtypeStruct((Bp, E), seqs.dtype),
        grid_spec=pltpu.PrefetchScalarGridSpec(
            num_scalar_prefetch=0,
            grid=(nb,),
            in_specs=[
                pl.BlockSpec((block_b, S, E), lambda b: (b, 0, 0)),   # seqs block
                pl.BlockSpec((block_b, S), lambda b: (b, 0)),         # mask bias
                pl.BlockSpec((E, H), lambda b: (0, 0)),               # w1
                pl.BlockSpec((1, H), lambda b: (0, 0)),               # b1
                pl.BlockSpec((1, H), lambda b: (0, 0)),               # w2 row
            ],
            out_specs=pl.BlockSpec((block_b, E), lambda b: (b, 0)),
        ),
        # NOTE: at realistic (large S*E) sizes re-derive block_b against the
        # per-generation VMEM budget (64 MiB v7x vs 128 MiB v5e/v6e) and set
        # vmem_limit_bytes; at these toy sizes the default scoped limit is ample.
        compiler_params=pltpu.CompilerParams(
            dimension_semantics=("parallel",),
        ),
    )(seqs, bias, w1, b1_2d, w2_row)
    return out[:B]


def self_attend_ref(seqs, w1, b1, w2, b2, seq_masks=None):
    """Pure-JAX reference mirroring the PyTorch forward (including b2)."""
    h = jnp.tanh(seqs @ w1 + b1)                   # [B, S, 30]
    gates = (h @ w2).squeeze(-1) + b2[0]           # [B, S]
    if seq_masks is not None:
        gates = jnp.where(seq_masks == 0, -1e9, gates)
    p = jax.nn.softmax(gates, axis=-1)[..., None]  # [B, S, 1]
    return jnp.sum(seqs * p, axis=1)               # [B, E]


if __name__ == "__main__":
    B, S, E, H = 16, 8, 32, 30

    key = jax.random.PRNGKey(0)
    k_x, k_w1, k_b1, k_w2, k_b2, k_m = jax.random.split(key, 6)

    seqs = jax.random.normal(k_x, (B, S, E), dtype=jnp.float32)

    # Deterministic parameter init (PyTorch Linear default: U(-1/sqrt(fan_in), +1/sqrt(fan_in)))
    lim1 = 1.0 / (E ** 0.5)
    w1 = jax.random.uniform(k_w1, (E, H), minval=-lim1, maxval=lim1, dtype=jnp.float32)
    b1 = jax.random.uniform(k_b1, (H,), minval=-lim1, maxval=lim1, dtype=jnp.float32)
    lim2 = 1.0 / (H ** 0.5)
    w2 = jax.random.uniform(k_w2, (H, 1), minval=-lim2, maxval=lim2, dtype=jnp.float32)
    b2 = jax.random.uniform(k_b2, (1,), minval=-lim2, maxval=lim2, dtype=jnp.float32)

    # A mask with a few zeroed positions.
    seq_masks = (jax.random.uniform(k_m, (B, S)) > 0.2).astype(jnp.float32)

    out = self_attend(seqs, w1, b1, w2, b2, seq_masks)
    out = jax.block_until_ready(out)

    ref = self_attend_ref(seqs, w1, b1, w2, b2, seq_masks)
    assert out.shape == (B, E)
    assert jnp.allclose(out, ref, atol=2e-5, rtol=1e-5), "mismatch vs reference"

    print("KERNEL_OK")
</pallas_src>

<mosaic_0001>
module attributes {stable_mosaic.version = 11 : i64} {
  func.func @_self_attend_kernel(%arg0: i32, %arg1: memref<8x8x32xf32, #tpu.memory_space<vmem>>, %arg2: memref<8x8xf32, #tpu.memory_space<vmem>>, %arg3: memref<32x30xf32, #tpu.memory_space<vmem>>, %arg4: memref<1x30xf32, #tpu.memory_space<vmem>>, %arg5: memref<1x30xf32, #tpu.memory_space<vmem>>, %arg6: memref<8x32xf32, #tpu.memory_space<vmem>>) attributes {dimension_semantics = [#tpu.dimension_semantics<parallel>], iteration_bounds = array<i64: 2>, scalar_prefetch = 0 : i64, scratch_operands = 0 : i64, tpu.core_type = #tpu.core_type<tc>, window_params = [{transform_indices = @transform_0, window_bounds = array<i64: 8, 8, 32>}, {transform_indices = @transform_1, window_bounds = array<i64: 8, 8>}, {pipeline_mode = #tpu.pipeline_mode<synchronous>, transform_indices = @transform_2, window_bounds = array<i64: 32, 30>}, {pipeline_mode = #tpu.pipeline_mode<synchronous>, transform_indices = @transform_3, window_bounds = array<i64: 1, 30>}, {pipeline_mode = #tpu.pipeline_mode<synchronous>, transform_indices = @transform_4, window_bounds = array<i64: 1, 30>}, {transform_indices = @transform_5, window_bounds = array<i64: 8, 32>}]} {
    %c0 = arith.constant 0 : index
    %c0_0 = arith.constant 0 : index
    %c0_1 = arith.constant 0 : index
    %0 = vector.load %arg1[%c0, %c0_0, %c0_1] : memref<8x8x32xf32, #tpu.memory_space<vmem>>, vector<8x8x32xf32>
    %1 = vector.shape_cast %0 : vector<8x8x32xf32> to vector<64x32xf32>
    %c0_2 = arith.constant 0 : index
    %c0_3 = arith.constant 0 : index
    %2 = vector.load %arg3[%c0_2, %c0_3] : memref<32x30xf32, #tpu.memory_space<vmem>>, vector<32x30xf32>
    %cst = arith.constant dense<0.000000e+00> : vector<64x30xf32>
    %3 = tpu.matmul %1, %2, %cst {dimension_numbers = #tpu.dot_dimension_numbers<[1], [0], [0], [1], [0, 0, 1, 1], [], []>} : vector<64x32xf32>, vector<32x30xf32>, vector<64x30xf32> -> vector<64x30xf32>
    %c0_4 = arith.constant 0 : index
    %c0_5 = arith.constant 0 : index
    %4 = vector.load %arg4[%c0_4, %c0_5] : memref<1x30xf32, #tpu.memory_space<vmem>>, vector<1x30xf32>
    %5 = vector.broadcast %4 : vector<1x30xf32> to vector<64x30xf32>
    %6 = arith.addf %3, %5 : vector<64x30xf32>
    %7 = math.tanh %6 : vector<64x30xf32>
    %8 = vector.shape_cast %7 : vector<64x30xf32> to vector<8x8x30xf32>
    %c0_6 = arith.constant 0 : index
    %c0_7 = arith.constant 0 : index
    %9 = vector.load %arg5[%c0_6, %c0_7] : memref<1x30xf32, #tpu.memory_space<vmem>>, vector<1x30xf32>
    %10 = vector.shape_cast %9 : vector<1x30xf32> to vector<1x1x30xf32>
    %11 = vector.broadcast %10 : vector<1x1x30xf32> to vector<8x8x30xf32>
    %12 = arith.mulf %8, %11 : vector<8x8x30xf32>
    %cst_8 = arith.constant dense<0.000000e+00> : vector<8x8xf32>
    %13 = vector.multi_reduction <add>, %12, %cst_8 [2] : vector<8x8x30xf32> to vector<8x8xf32>
    %c0_9 = arith.constant 0 : index
    %c0_10 = arith.constant 0 : index
    %14 = vector.load %arg2[%c0_9, %c0_10] : memref<8x8xf32, #tpu.memory_space<vmem>>, vector<8x8xf32>
    %15 = arith.addf %13, %14 : vector<8x8xf32>
    %cst_11 = arith.constant dense<0xFF800000> : vector<8xf32>
    %16 = vector.multi_reduction <maximumf>, %15, %cst_11 [1] : vector<8x8xf32> to vector<8xf32>
    %17 = vector.shape_cast %16 : vector<8xf32> to vector<8x1xf32>
    %18 = vector.broadcast %17 : vector<8x1xf32> to vector<8x8xf32>
    %19 = arith.subf %15, %18 : vector<8x8xf32>
    %20 = math.exp %19 : vector<8x8xf32>
    %cst_12 = arith.constant dense<0.000000e+00> : vector<8xf32>
    %21 = vector.multi_reduction <add>, %20, %cst_12 [1] : vector<8x8xf32> to vector<8xf32>
    %22 = vector.shape_cast %21 : vector<8xf32> to vector<8x1xf32>
    %23 = tpu.reciprocal %22 : vector<8x1xf32> -> vector<8x1xf32>
    %24 = vector.broadcast %23 : vector<8x1xf32> to vector<8x8xf32>
    %25 = arith.mulf %20, %24 : vector<8x8xf32>
    %26 = vector.shape_cast %25 : vector<8x8xf32> to vector<8x1x8xf32>
    "tpu.trace_start"() <{level = 10 : i32, message = "bqs,bse->bqe"}> : () -> ()
    %cst_13 = arith.constant dense<0.000000e+00> : vector<8x1x32xf32>
    %27 = tpu.matmul %26, %0, %cst_13 {dimension_numbers = #tpu.dot_dimension_numbers<[2], [1], [1], [2], [0, 0, 0, 1, 1, 2], [0], [0]>} : vector<8x1x8xf32>, vector<8x8x32xf32>, vector<8x1x32xf32> -> vector<8x1x32xf32>
    "tpu.trace_stop"() : () -> ()
    %28 = vector.shape_cast %27 : vector<8x1x32xf32> to vector<8x32xf32>
    %c0_14 = arith.constant 0 : index
    %c0_15 = arith.constant 0 : index
    %29 = vector.load %arg6[%c0_14, %c0_15] : memref<8x32xf32, #tpu.memory_space<vmem>>, vector<8x32xf32>
    tpu.vector_store %arg6[%c0_14, %c0_15], %28 {strides = array<i32>} : memref<8x32xf32, #tpu.memory_space<vmem>>, vector<8x32xf32>,
    return
  }
  func.func @transform_0(%arg0: i32) -> (i32, i32, i32) {
    %c0_i32 = arith.constant 0 : i32
    %c0_i32_0 = arith.constant 0 : i32
    %c0_i32_1 = arith.constant 0 : i32
    return %arg0, %c0_i32, %c0_i32_0 : i32, i32, i32
  }
  func.func @transform_1(%arg0: i32) -> (i32, i32) {
    %c0_i32 = arith.constant 0 : i32
    %c0_i32_0 = arith.constant 0 : i32
    return %arg0, %c0_i32 : i32, i32
  }
  func.func @transform_2(%arg0: i32) -> (i32, i32) {
    %c0_i32 = arith.constant 0 : i32
    %c0_i32_0 = arith.constant 0 : i32
    %c0_i32_1 = arith.constant 0 : i32
    return %c0_i32, %c0_i32_0 : i32, i32
  }
  func.func @transform_3(%arg0: i32) -> (i32, i32) {
    %c0_i32 = arith.constant 0 : i32
    %c0_i32_0 = arith.constant 0 : i32
    %c0_i32_1 = arith.constant 0 : i32
    return %c0_i32, %c0_i32_0 : i32, i32
  }
  func.func @transform_4(%arg0: i32) -> (i32, i32) {
    %c0_i32 = arith.constant 0 : i32
    %c0_i32_0 = arith.constant 0 : i32
    %c0_i32_1 = arith.constant 0 : i32
    return %c0_i32, %c0_i32_0 : i32, i32
  }
  func.func @transform_5(%arg0: i32) -> (i32, i32) {
    %c0_i32 = arith.constant 0 : i32
    %c0_i32_0 = arith.constant 0 : i32
    return %arg0, %c0_i32 : i32, i32
  }
}

</mosaic_0001>

<bundles_post_ra>
// kernel: tpu_custom_call.1
= control target key start
LH: loop header
LB: loop body
LE: loop exit
PB: predicated region body
PF: predicated region fallthrough
CT: control target
= control target key end

     0   :  { %10 = vsyncpa [#allocation3], 0  ;;  %s1624_s0 = inlined_call_operand.hbm [shape: f32[16,8,32], index: 0, kind: input, shape index: {}]   ;;  %s1625_s1 = inlined_call_operand.vmem [shape: f32[16,8], index: 1, kind: input, shape index: {}]   ;;  %s1626_s2 = inlined_call_operand.hbm [shape: f32[32,30], index: 2, kind: input, shape index: {}]   ;;  %s1627_s3 = inlined_call_operand.vmem [shape: f32[1,30], index: 3, kind: input, shape index: {}]   ;;  %s1628_s4 = inlined_call_operand.vmem [shape: f32[1,30], index: 4, kind: input, shape index: {}]   ;;  %s1629_s5 = inlined_call_operand.hbm [shape: f32[16,32], index: 5, kind: output, shape index: {}]  }
   0x1   :  { %12 = vsyncpa [#allocation3 + $0x1], 0 }
   0x2   :  { %13 = vsyncpa [#allocation6], 0 }
   0x3   :  { %14 = vsyncpa [#allocation4], 0 }
   0x4   :  { %16 = vsyncpa [#allocation4 + $0x1], 0  ;;  %s1334_s18 = smov 0   ;;  %s1336_s19 = smov 0  }
   0x5   :  { %s1338_s20 = smov 0   ;;  %s1340_s21 = smov 0  }
   0x6 LB: > { %s1355_s22 = sadd.s32 4294967295, %s1298_s21   ;;  %s1021_s23 = sadd.s32 4294967294, %s1298_s21   ;;  %s1298_s21 = sphi %s1340_s21, %s1641_s21   ;;  %s1294_s20 = sphi %s1338_s20, %s1640_s20   ;;  %s1290_s19 = sphi %s1336_s19, %s1639_s19   ;;  %s1286_s18 = sphi %s1334_s18, %s1638_s18  }
   0x7   : > { %p42_p0 = scmp.ne.s32.totalorder %s1290_s19, %s1286_s18  ;;  %p43_p1 = scmp.eq.s32.totalorder %s1355_s22, 0 }
   0x8   : > { %p155_p2 = scmp.eq.s32.totalorder %s1355_s22, 1  ;;  %p161_p3 = scmp.eq.s32.totalorder %s1021_s23, 1 }
   0x9   : > { %p1364_p4 = por %p43_p1, %p42_p0  ;;  %p1022_p5 = scmp.ge.s32.totalorder %s1298_s21, 1 }
   0xa   : > { %p1369_p6 = por %p161_p3, %p42_p0  ;;  %p168_p7 = scmp.lt.s32.totalorder %s1298_s21, 3 }
   0xb   : > { %s179_s28 = sshll.u32 %s1626_s2, 4  ;;  %s1300_s30 = smov [#allocation5]   ;;  %s180_s28 = int_to_ptr.hbm [resolvable:$true] %s179_s28 }
   0xc   : > { %p1377_p8 = pnand %p1022_p5, %p168_p7  ;;  %s181_s6 = sshll.u32 %s1300_s30, 4  ;;  %s182_s6 = int_to_ptr.vmem [resolvable:$true] %s181_s6 }
   0xd   : > { %s1387_s7 = sadd.s32 1, %s1298_s21   ;;  %s1630_s8 = smov 128  }
   0xe   : > { %p1074_p9 = pneg %p1377_p8  ;;  %s1302_s9 = smov 8  }
   0xf   : > { %s26_s10 = ssub.s32 %s1298_s21, %s1387_s7  ;;  %s29_s11 = sadd.s32 1, %s1294_s20 }
  0x10   : > { %p1075_p10 = pnand %p1074_p9, %p43_p1  ;;  %p27_p12 = scmp.eq.s32.totalorder %s26_s10, 0 }
  0x11   : > { %p36_p13 = scmp.ne.s32.totalorder %s1294_s20, %s1290_s19  ;;  %p37_p0 = scmp.eq.s32.totalorder %s1298_s21, 0 }
  0x12   : > { %1077 = dma.hbm_to_vmem [thread:$0]  (!%p1075_p10), %s180_s28, 512, %s182_s6, [#allocation6], %s1630_s8, %s1630_s8, %s1302_s9  }
  0x13   : > { %s1399_s12 = scalar_select %p27_p12, %s1294_s20, %s29_s11  }
  0x14   : > { %p1403_p3 = por %p155_p2, %p36_p13  ;;  %p1087_p5 = scmp.lt.s32.totalorder %s1298_s21, 2 }
  0x15   : > { %s201_s14 = sand.u32 1, %s1294_s20   ;;  %s1053_s15 = sshll.u32 %s1298_s21, 6 }
  0x16   : > { %p38_p7 = por %p37_p0, %p36_p13  ;;  %s1025_s16 = sshll.u32 %s201_s14, 6 }
  0x17   : > { %s210_s26 = scalar_lea.hbm %s1624_s0, %s1053_s15  ;;  %s205_s28 = scalar_lea.vmem [#allocation2], %s1025_s16 }
  0x18   : > { %s211_s27 = sshll.u32 %s210_s26, 4  ;;  %s213_s30 = sshll.u32 %s205_s28, 4  ;;  %s212_s27 = int_to_ptr.hbm [resolvable:$true] %s211_s27  ;;  %s214_s30 = int_to_ptr.vmem [resolvable:$true] %s213_s30 }
  0x19   : > { %p1413_p9 = pnand %p1087_p5, %p38_p7  ;;  %s202_s10 = scalar_lea.sflag [#allocation3], %s201_s14 }
  0x1a   : > { %s1198_s11 = sshra.s32 %s212_s27, 4  ;;  %s1205_s16 = scalar_lea.hbm %s1624_s0, 128  ;;  %s1199_s11 = int_to_ptr.hbm [resolvable:$true] %s1198_s11 }
  0x1b   : > { %s1200_s8 = scalar_lea.hbm %s1199_s11, 64  ;;  %p1202_p10 = pneg %p1413_p9 }
  0x1c   : > { %p1201_p2 = scmp.ne.s32.totalorder %s1199_s11, %s1200_s8  ;;  %p1206_p0 = scmp.lt.s32.totalorder %s1199_s11, %s1624_s0 }
  0x1d   : > { %p1207_p5 = scmp.lt.s32.totalorder %s1205_s16, %s1200_s8 }
  0x1e   : > { %p1203_p12 = pnand %p1202_p10, %p1201_p2 }
  0x1f   : > { %p1208_p7 = por %p1207_p5, %p1206_p0 }
  0x20   : > { %p1204_p13 = pneg %p1203_p12 }
  0x22   : > { %p1209_p11 = pnand %p1208_p7, %p1204_p13 }
  0x24   : > { %1212 = shalt.err (!%p1209_p11)
}
  0x25   : > { %s1636_s14 = smov 128   ;;  %232 = sbr.rel (%p1377_p8) target bundleno = 1146 (0x47a), region = 40 }
  0x26   : > { %1081 = dma.hbm_to_vmem [thread:$0]  (!%p1413_p9), %s212_s27, 1024, %s214_s30, %s202_s10, %s1636_s14, %s1636_s14, %s1302_s9  }
  0x27   : > { %s1433_s28 = sand.u32 (!%p1377_p8), 1, %s1290_s19  }
  0x28   : > { %s1029_s11 = sshll.u32 (!%p1377_p8), %s1433_s28, 6  ;;  %s235_s8 = scalar_lea.sflag (!%p1377_p8), [#allocation3], %s1433_s28 }
  0x29   : > { %s1437_s15 = scalar_lea.vmem (!%p1377_p8), [#allocation2], %s1029_s11 }
  0x2a   : > { %1273 = dma.done.wait (%p1364_p4), %s235_s8, 1024  }
  0x2b   : > { %1275 = vsyncadd (%p1364_p4), %s235_s8, 4294966272 }
  0x2c   : > { %1277 = dma.done.wait (%p43_p1), [#allocation6], 512  }
  0x2d   : > { %1279 = vsyncadd (%p43_p1), [#allocation6], 4294966784  ;;  %p276_p8 = scmp.lt.s32.totalorder %s1355_s22, 1  ;;  %v291_v0 = vld [vmem:[#allocation5 + $0x18] sm:$0xff]  ;;  %v290_v1 = vld [vmem:[#allocation5 + $0x10] sm:$0xff]  ;;  %v410_v3 = vlaneseq  ;;  %vm296_vm0 = vcmask 261120  }
  0x2e   : > { %333 = vmatpush.msra.mxu0 %v291_v0  ;;  %1054 = vmatpush.msra.mxu1 %v291_v0  ;;  %v289_v2 = vld [vmem:[#allocation5 + $0x8] sm:$0xff]  ;;  %v288_v4 = vld [vmem:[#allocation5] sm:$0xff]  ;;  %v1453_v8 = vld [vmem:[%s1437_s15 + $0x30] sm:$0xff]  ;;  %vm382_vm1 = vcmask 244736   ;;  %vm523_vm2 = vcmask 1041409   ;;  %vm525_vm3 = vcmask 1042434  }
  0x2f   : > { %1055 = vmatpush.msra.mxu2 %v291_v0  ;;  %1056 = vmatpush.msra.mxu3 %v291_v0  ;;  %s277_s24 = scalar_select %p276_p8, %s1355_s22, 1  ;;  %v280_v5 = vld [vmem:[%s1437_s15] sm:$0xff]  ;;  %v285_v7 = vld [vmem:[%s1437_s15 + $0x28] sm:$0xff]  ;;  %v411_v9 = vshrl.u32 %v410_v3, 7  ;;  %v282_v11 = vld [vmem:[%s1437_s15 + $0x10] sm:$0xff]  ;;  %vm527_vm4 = vcmask 1043459  }
  0x30   : > { %334 = vmatpush.msra.mxu0 %v290_v1  ;;  %1057 = vmatpush.msra.mxu1 %v290_v1  ;;  %v284_v6 = vld [vmem:[%s1437_s15 + $0x20] sm:$0xff]  ;;  %v281_v10 = vld [vmem:[%s1437_s15 + $0x8] sm:$0xff]  ;;  %v283_v13 = vld [vmem:[%s1437_s15 + $0x18] sm:$0xff]  ;;  %vm529_vm5 = vcmask 1044484   ;;  %vm531_vm6 = vcmask 1045509   ;;  %vm533_vm7 = vcmask 1046534  }
  0x31   : > { %1058 = vmatpush.msra.mxu2 %v290_v1  ;;  %1059 = vmatpush.msra.mxu3 %v290_v1  ;;  %s1032_s29 = sshll.u32 %s277_s24, 3  ;;  %v1468_v14 = vld [vmem:[%s1437_s15 + $0x38] sm:$0xff]  ;;  %v1132_v23 = vld [vmem:[%s1627_s3] ss:$0 sm:$0xff]  ;;  %vm535_vm8 = vcmask 1047559   ;;  %vm538_vm9 = vcmask 64512  }
  0x32   : > { %335 = vmatpush.msra.mxu0 %v289_v2  ;;  %1060 = vmatpush.msra.mxu1 %v289_v2  ;;  %s279_s30 = scalar_lea.vmem %s1625_s1, %s1032_s29  ;;  %v1133_v28 = vld [vmem:[%s1628_s4] ss:$0 sm:$0xff]  ;;  %s1031_s23 = sshll.u32 %s1433_s28, 3 }
  0x33   : > { %1061 = vmatpush.msra.mxu2 %v289_v2  ;;  %1062 = vmatpush.msra.mxu3 %v289_v2  ;;  %v407_v12 = vld [vmem:[%s279_s30] sm:$0xff]  ;;  %v1303_v2 = vmov 0   ;;  %s1050_s26 = sshll.u32 %s1355_s22, 3  ;;  %s274_s15 = scalar_lea.vmem [#allocation7], %s1031_s23 }
  0x34   : > { %336 = vmatpush.msra.mxu0 %v288_v4  ;;  %1063 = vmatpush.msra.mxu1 %v288_v4  ;;  %v416_v15 = vperm.slane %v407_v12, 1  ;;  %v409_v16 = vperm.slane %v407_v12, 0  ;;  %v423_v17 = vperm.slane %v407_v12, 2  ;;  %v430_v18 = vperm.slane %v407_v12, 3  ;;  %s924_s8 = scalar_lea.hbm %s1629_s5, %s1050_s26  ;;  %s926_s24 = sshll.u32 %s274_s15, 4  ;;  %s927_s24 = int_to_ptr.vmem [resolvable:$true] %s926_s24 }
  0x35   : > { %1033 = vmatmul.msk.f32.vlgmr.msra.gmra.mxu0 %vm296_vm0, %v280_v5  ;;  %1037 = vmatmul.msk.f32.vlgmr.msra.gmra.mxu1 %vm296_vm0, %v284_v6  ;;  %v458_v19 = vperm.slane %v407_v12, 7  ;;  %v437_v20 = vperm.slane %v407_v12, 4  ;;  %v444_v21 = vperm.slane %v407_v12, 5  ;;  %v451_v22 = vperm.slane %v407_v12, 6  ;;  %s928_s22 = sshll.u32 %s924_s8, 4  ;;  %s914_s29 = scalar_lea.sflag [#allocation4], %s1433_s28  ;;  %s929_s22 = int_to_ptr.hbm [resolvable:$true] %s928_s22 }
  0x36   : > { %1064 = vmatpush.msra.mxu2 %v288_v4  ;;  %1065 = vmatpush.msra.mxu3 %v288_v4  ;;  %s1242_s9 = sshra.s32 %s929_s22, 4  ;;  %s1248_s10 = scalar_lea.hbm %s1629_s5, 16  ;;  %s1243_s9 = int_to_ptr.hbm [resolvable:$true] %s1242_s9 }
  0x37   : > { %1038 = vmatmul.msk.f32.vlgmr.msra.gmra.mxu2 %vm296_vm0, %v285_v7  ;;  %1039 = vmatmul.msk.f32.vlgmr.msra.gmra.mxu3 %vm296_vm0, %v1453_v8  ;;  %s1244_s27 = scalar_lea.hbm %s1243_s9, 8  ;;  %p1249_p9 = scmp.lt.s32.totalorder %s1243_s9, %s1629_s5 }
  0x38   : > { %1127 = vset.pattern.permute.xlu2 %v411_v9  ;;  %1126 = vset.pattern.permute.xlu1 %v411_v9  ;;  %p1245_p1 = scmp.ne.s32.totalorder %s1243_s9, %s1244_s27  ;;  %p1250_p2 = scmp.lt.s32.totalorder %s1248_s10, %s1244_s27 }
  0x39   : > { %1128 = vset.pattern.permute.xlu0 %v411_v9  ;;  %695 = vmatpush.msrb.mxu1 %v280_v5 }
  0x3a   : > { %722 = vmatpush.msrb.mxu2 %v281_v10  ;;  %749 = vmatpush.msrb.mxu3 %v282_v11  ;;  %p1246_p4 = pnand %p1245_p1, %p1403_p3  ;;  %p1251_p10 = por %p1250_p2, %p1249_p9 }
  0x3b   : > { %776 = vmatpush.msra.mxu1 %v283_v13 }
  0x3c   : > { %803 = vmatpush.msra.mxu2 %v284_v6  ;;  %830 = vmatpush.msra.mxu3 %v285_v7  ;;  %p1247_p11 = pneg %p1246_p4 }
  0x3d   : > { %1034 = vmatmul.msk.f32.gmra.mxu0 %vm296_vm0, %v281_v10 }
  0x3e   : > { %p1252_p12 = pnand %p1251_p10, %p1247_p11 }
  0x3f   : > { %1040 = vmatmul.msk.f32.gmra.mxu3 %vm296_vm0, %v1468_v14 }
  0x40   : > { %421 = vperm.xlu2 %1127, %v416_v15   ;;  %414 = vperm.xlu1 %1126, %v409_v16  }
  0x41   : > { %428 = vperm.xlu0 %1128, %v423_v17  }
  0x45   : > { %1035 = vmatmul.msk.f32.gmra.mxu0 %vm296_vm0, %v282_v11 }
  0x48   : > { %435 = vperm.xlu2 %1127, %v430_v18   ;;  %463 = vperm.xlu1 %1126, %v458_v19  }
  0x49   : > { %1130 = vset.pattern.permute.xlu0 %v1303_v2 }
  0x4d   : > { %1036 = vmatmul.msk.f32.gmra.mxu0 %vm296_vm0, %v283_v13 }
  0x50   : > { %442 = vperm.xlu2 %1127, %v437_v20   ;;  %1131 = vset.pattern.permute.xlu1 %v1303_v2 }
  0x58   : > { %449 = vperm.xlu2 %1127, %v444_v21  }
  0x60   : > { %456 = vperm.xlu2 %1127, %v451_v22  }
  0x68   : > { %1129 = vset.pattern.permute.xlu2 %v1303_v2 }
  0x9a   : > { %v422_v1 = vpop.permute.xlu2 %421 }
  0xa2   : > { %v436_v4 = vpop.permute.xlu2 %435 }
  0xaa   : > { %v443_v6 = vpop.permute.xlu2 %442 }
  0xb2   : > { %v338_v24 = vpop.f32.mrf.mxu0  ;;  %v350_v25 = vpop.f32.mrf.mxu1 }
  0xb3   : > { %v339_v26 = vadd.f32 %v1132_v23, %v338_v24  ;;  %v351_v27 = vadd.f32 %v1132_v23, %v350_v25  ;;  %v415_v5 = vpop.permute.xlu1 %414  ;;  %v429_v7 = vpop.permute.xlu0 %428 }
  0xb4   : > { %v450_v10 = vpop.permute.xlu2 %449 }
  0xb5   : > { %1134 = vtanh.f32 %v339_v26 }
  0xb6   : > { %1136 = vtanh.f32 %v351_v27 }
  0xba   : > { %v341_v29 = vpop.f32.mrf.mxu0  ;;  %v353_v30 = vpop.f32.mrf.mxu2 }
  0xbb   : > { %v1135_v31 = vpop.eup %1134  ;;  %v354_v32 = vadd.f32 %v1132_v23, %v353_v30  ;;  %v356_v33 = vpop.f32.mrf.mxu3  ;;  %v342_v35 = vadd.f32 %v1132_v23, %v341_v29 }
  0xbc   : > { %v1137_v34 = vpop.eup %1136  ;;  %v357_v36 = vadd.f32 %v1132_v23, %v356_v33  ;;  %v374_v37 = vmul.f32 %v1135_v31, %v1133_v28  ;;  %v464_v9 = vpop.permute.xlu1 %463 }
  0xbd   : > { %v378_v38 = vmul.f32 %v1137_v34, %v1133_v28  ;;  %1138 = vtanh.f32 %v354_v32  ;;  %v457_v17 = vpop.permute.xlu2 %456  ;;  %v1502_v34 = vand.u32 127, %v410_v3 }
  0xbe   : > { %v383_v39 = vsel %vm382_vm1, %v374_v37, 0.0  ;;  %1140 = vtanh.f32 %v357_v36 }
  0xbf   : > { %v395_v40 = vsel %vm382_vm1, %v378_v38, 0.0  ;;  %384 = vadd.xlane.f32.xlu0 %v383_v39  ;;  %1142 = vtanh.f32 %v342_v35 }
  0xc0   : > { %396 = vadd.xlane.f32.xlu1 %v395_v40 }
  0xc2   : > { %v344_v41 = vpop.f32.mrf.mxu0 }
  0xc3   : > { %v359_v42 = vpop.f32.mrf.mxu3  ;;  %v1139_v43 = vpop.eup %1138  ;;  %v345_v46 = vadd.f32 %v1132_v23, %v344_v41 }
  0xc4   : > { %v360_v44 = vadd.f32 %v1132_v23, %v359_v42  ;;  %v1141_v45 = vpop.eup %1140  ;;  %v379_v47 = vmul.f32 %v1139_v43, %v1133_v28 }
  0xc5   : > { %v1143_v48 = vpop.eup %1142  ;;  %v380_v49 = vmul.f32 %v1141_v45, %v1133_v28 }
  0xc6   : > { %1144 = vtanh.f32 %v360_v44  ;;  %v398_v50 = vsel %vm382_vm1, %v379_v47, 0.0  ;;  %v375_v52 = vmul.f32 %v1143_v48, %v1133_v28 }
  0xc7   : > { %v401_v51 = vsel %vm382_vm1, %v380_v49, 0.0  ;;  %399 = vadd.xlane.f32.xlu0 %v398_v50  ;;  %1146 = vtanh.f32 %v345_v46 }
  0xc8   : > { %402 = vadd.xlane.f32.xlu1 %v401_v51  ;;  %v386_v57 = vsel %vm382_vm1, %v375_v52, 0.0 }
  0xca   : > { %v347_v53 = vpop.f32.mrf.mxu0 }
  0xcb   : > { %v348_v54 = vadd.f32 %v1132_v23, %v347_v53 }
  0xcc   : > { %v1145_v55 = vpop.eup %1144 }
  0xcd   : > { %1148 = vtanh.f32 %v348_v54  ;;  %v381_v56 = vmul.f32 %v1145_v55, %v1133_v28  ;;  %v1147_v58 = vpop.eup %1146 }
  0xce   : > { %v376_v60 = vmul.f32 %v1147_v58, %v1133_v28 }
  0xcf   : > { %v404_v59 = vsel %vm382_vm1, %v381_v56, 0.0  ;;  %387 = vadd.xlane.f32.xlu0 %v386_v57 }
  0xd0   : > { %405 = vadd.xlane.f32.xlu1 %v404_v59  ;;  %v389_v0 = vsel %vm382_vm1, %v376_v60, 0.0 }
  0xd3   : > { %v1149_v61 = vpop.eup %1148 }
  0xd4   : > { %v377_v62 = vmul.f32 %v1149_v61, %v1133_v28 }
  0xd6   : > { %v392_v63 = vsel %vm382_vm1, %v377_v62, 0.0 }
  0xd7   : > { %393 = vadd.xlane.f32.xlu2 %v392_v63 }
  0xd8   : > { %390 = vadd.xlane.f32.xlu1 %v389_v0 }
 0x132   : > { %v385_v11 = vpop.xlane.xlu0 %384 }
 0x133   : > { %v397_v12 = vpop.xlane.xlu1 %396  ;;  %v473_v13 = vadd.f32 %v415_v5, %v385_v11 }
 0x134   : > { %v1489_v15 = vadd.f32 %v443_v6, %v397_v12 }
 0x135   : > { %490 = vperm.xlu2 %1129, %v473_v13  }
 0x136   : > { %502 = vperm.xlu1 %1131, %v1489_v15  }
 0x13a   : > { %v400_v16 = vpop.xlane.xlu0 %399 }
 0x13b   : > { %v403_v18 = vpop.xlane.xlu1 %402  ;;  %v1492_v19 = vadd.f32 %v450_v10, %v400_v16 }
 0x13c   : > { %v1494_v20 = vadd.f32 %v457_v17, %v403_v18 }
 0x13d   : > { %505 = vperm.xlu2 %1129, %v1492_v19  }
 0x13e   : > { %508 = vperm.xlu1 %1131, %v1494_v20  }
 0x142   : > { %v388_v21 = vpop.xlane.xlu0 %387 }
 0x143   : > { %v406_v22 = vpop.xlane.xlu1 %405  ;;  %v474_v23 = vadd.f32 %v422_v1, %v388_v21 }
 0x144   : > { %v1498_v28 = vadd.f32 %v464_v9, %v406_v22 }
 0x145   : > { %493 = vperm.xlu0 %1130, %v474_v23  }
 0x14a   : > { %v394_v26 = vpop.xlane.xlu2 %393 }
 0x14b   : > { %v391_v24 = vpop.xlane.xlu1 %390  ;;  %v476_v27 = vadd.f32 %v436_v4, %v394_v26 }
 0x14c   : > { %v475_v25 = vadd.f32 %v429_v7, %v391_v24 }
 0x14e   : > { %496 = vperm.xlu2 %1129, %v475_v25  }
 0x156   : > { %499 = vperm.xlu2 %1129, %v476_v27  }
 0x15e   : > { %511 = vperm.xlu2 %1129, %v1498_v28  }
 0x18f   : > { %v491_v29 = vpop.permute.xlu2 %490 }
 0x190   : > { %v515_v36 = vperm.slane %v491_v29, %v1502_v34 }
 0x197   : > { %v506_v30 = vpop.permute.xlu2 %505 }
 0x198   : > { %v520_v44 = vperm.slane %v506_v30, %v1502_v34 }
 0x1a8   : > { %v497_v31 = vpop.permute.xlu2 %496  ;;  %v503_v32 = vpop.permute.xlu1 %502 }
 0x1a9   : > { %v517_v38 = vperm.slane %v497_v31, %v1502_v34  ;;  %v519_v42 = vperm.slane %v503_v32, %v1502_v34 }
 0x1b0   : > { %v500_v33 = vpop.permute.xlu2 %499  ;;  %v509_v39 = vpop.permute.xlu1 %508 }
 0x1b1   : > { %v518_v40 = vperm.slane %v500_v33, %v1502_v34  ;;  %v521_v46 = vperm.slane %v509_v39, %v1502_v34 }
 0x1b7   : > { %v494_v35 = vpop.permute.xlu0 %493 }
 0x1b8   : > { %v516_v37 = vperm.slane %v494_v35, %v1502_v34  ;;  %v512_v3 = vpop.permute.xlu2 %511 }
 0x1b9   : > { %v522_v48 = vperm.slane %v512_v3, %v1502_v34 }
 0x1ba   : > { %v524_v41 = vsel %vm523_vm2, %v516_v37, %v515_v36 }
 0x1bb   : > { %v526_v43 = vsel %vm525_vm3, %v517_v38, %v524_v41 }
 0x1bc   : > { %v528_v45 = vsel %vm527_vm4, %v518_v40, %v526_v43 }
 0x1bd   : > { %v530_v47 = vsel %vm529_vm5, %v519_v42, %v528_v45 }
 0x1be   : > { %v532_v49 = vsel %vm531_vm6, %v520_v44, %v530_v47 }
 0x1bf   : > { %v534_v50 = vsel %vm533_vm7, %v521_v46, %v532_v49 }
 0x1c0   : > { %v536_v51 = vsel %vm535_vm8, %v522_v48, %v534_v50 }
 0x1c1   : > { %v539_v52 = vsel %vm538_vm9, %v536_v51, -inf }
 0x1c2   : > { %540 = vmax.xlane.f32.xlu1 %v539_v52 }
 0x235   : > { %v541_v53 = vpop.xlane.xlu1 %540 }
 0x236   : > { %v544_v54 = vperm.slane %v541_v53, 1  ;;  %v543_v55 = vperm.slane %v541_v53, 0  ;;  %v546_v58 = vperm.slane %v541_v53, 3  ;;  %v545_v59 = vperm.slane %v541_v53, 2 }
 0x237   : > { %v548_v1 = vperm.slane %v541_v53, 5  ;;  %v547_v4 = vperm.slane %v541_v53, 4  ;;  %v550_v11 = vperm.slane %v541_v53, 7 }
 0x238   : > { %v560_v56 = vsub.f32 %v474_v23, %v544_v54  ;;  %v559_v57 = vsub.f32 %v473_v13, %v543_v55  ;;  %v562_v62 = vsub.f32 %v476_v27, %v546_v58  ;;  %v561_v63 = vsub.f32 %v475_v25, %v545_v59 }
 0x239   : > { %v564_v7 = vsub.f32 %v1492_v19, %v548_v1  ;;  %v563_v9 = vsub.f32 %v1489_v15, %v547_v4  ;;  %v549_v13 = vperm.slane %v541_v53, 6  ;;  %v566_v18 = vsub.f32 %v1498_v28, %v550_v11 }
 0x23a   : > { %v569_v60 = vmul.f32 1.442695, %v560_v56  ;;  %v567_v61 = vmul.f32 1.442695, %v559_v57  ;;  %v573_v0 = vmul.f32 1.442695, %v562_v62 }
 0x23b   : > { %v571_v2 = vmul.f32 1.442695, %v561_v63  ;;  %v577_v10 = vmul.f32 1.442695, %v564_v7  ;;  %v575_v12 = vmul.f32 1.442695, %v563_v9  ;;  %v565_v19 = vsub.f32 %v1494_v20, %v549_v13 }
 0x23c   : > { %1150 = vpow2.f32 %v569_v60  ;;  %v581_v21 = vmul.f32 1.442695, %v566_v18 }
 0x23d   : > { %1152 = vpow2.f32 %v567_v61  ;;  %v579_v15 = vmul.f32 1.442695, %v565_v19 }
 0x23e   : > { %1154 = vpow2.f32 %v573_v0 }
 0x23f   : > { %1156 = vpow2.f32 %v571_v2 }
 0x240   : > { %1158 = vpow2.f32 %v577_v10 }
 0x241   : > { %1160 = vpow2.f32 %v575_v12 }
 0x242   : > { %v1520_v5 = vpop.eup %1150  ;;  %1162 = vpow2.f32 %v581_v21 }
 0x243   : > { %v1522_v6 = vpop.eup %1152  ;;  %595 = vperm.xlu0 %1130, %v1520_v5   ;;  %1164 = vpow2.f32 %v579_v15 }
 0x244   : > { %592 = vperm.xlu2 %1129, %v1522_v6   ;;  %v1528_v16 = vpop.eup %1154 }
 0x245   : > { %v1530_v17 = vpop.eup %1156 }
 0x246   : > { %v1159_v22 = vpop.eup %1158 }
 0x247   : > { %v1536_v23 = vpop.eup %1160 }
 0x248   : > { %v1539_v24 = vpop.eup %1162 }
 0x249   : > { %v1165_v25 = vpop.eup %1164 }
 0x24b   : > { %601 = vperm.xlu0 %1130, %v1528_v16  }
 0x24c   : > { %598 = vperm.xlu2 %1129, %v1530_v17  }
 0x253   : > { %607 = vperm.xlu0 %1130, %v1159_v22  }
 0x254   : > { %604 = vperm.xlu2 %1129, %v1536_v23  }
 0x25b   : > { %613 = vperm.xlu0 %1130, %v1539_v24  }
 0x25c   : > { %610 = vperm.xlu2 %1129, %v1165_v25  }
 0x29e   : > { %v593_v26 = vpop.permute.xlu2 %592 }
 0x29f   : > { %v615_v31 = vperm.slane %v593_v26, %v1502_v34 }
 0x2a6   : > { %v599_v28 = vpop.permute.xlu2 %598 }
 0x2a7   : > { %v617_v35 = vperm.slane %v599_v28, %v1502_v34 }
 0x2ae   : > { %v605_v29 = vpop.permute.xlu2 %604 }
 0x2af   : > { %v619_v40 = vperm.slane %v605_v29, %v1502_v34 }
 0x2b5   : > { %v596_v27 = vpop.permute.xlu0 %595 }
 0x2b6   : > { %v616_v30 = vperm.slane %v596_v27, %v1502_v34  ;;  %v611_v41 = vpop.permute.xlu2 %610 }
 0x2b7   : > { %v621_v43 = vperm.slane %v611_v41, %v1502_v34 }
 0x2b8   : > { %v623_v32 = vsel %vm523_vm2, %v616_v30, %v615_v31 }
 0x2b9   : > { %v624_v37 = vsel %vm525_vm3, %v617_v35, %v623_v32 }
 0x2bd   : > { %v602_v20 = vpop.permute.xlu0 %601 }
 0x2be   : > { %v618_v33 = vperm.slane %v602_v20, %v1502_v34 }
 0x2c0   : > { %v625_v38 = vsel %vm527_vm4, %v618_v33, %v624_v37 }
 0x2c1   : > { %v626_v42 = vsel %vm529_vm5, %v619_v40, %v625_v38 }
 0x2c5   : > { %v608_v36 = vpop.permute.xlu0 %607 }
 0x2c6   : > { %v620_v39 = vperm.slane %v608_v36, %v1502_v34 }
 0x2c8   : > { %v627_v3 = vsel %vm531_vm6, %v620_v39, %v626_v42 }
 0x2c9   : > { %v628_v46 = vsel %vm533_vm7, %v621_v43, %v627_v3 }
 0x2cd   : > { %v614_v44 = vpop.permute.xlu0 %613 }
 0x2ce   : > { %v622_v45 = vperm.slane %v614_v44, %v1502_v34 }
 0x2d0   : > { %v629_v47 = vsel %vm535_vm8, %v622_v45, %v628_v46 }
 0x2d1   : > { %v631_v48 = vsel %vm538_vm9, %v629_v47, 0.0 }
 0x2d2   : > { %632 = vadd.xlane.f32.xlu2 %v631_v48 }
 0x345   : > { %v633_v49 = vpop.xlane.xlu2 %632 }
 0x346   : > { %1166 = vrcp.f32 %v633_v49  ;;  %v645_v53 = vand.u32 2147483648, %v633_v49  ;;  %v643_v55 = vand.u32 2147483647, %v633_v49  ;;  %vm639_vm11 = vweird.f32 %v633_v49 }
 0x348   : > { %v646_v57 = vor.u32 1.1754944e-38, %v645_v53  ;;  %vm644_vm13 = vcmp.eq.f32.partialorder %v643_v55, 8.507059e+37 }
 0x34c   : > { %v1167_v50 = vpop.eup %1166 }
 0x34d   : > { %v635_v51 = vmul.f32 %v1167_v50, %v633_v49  ;;  %vm640_vm10 = vweird.f32 %v1167_v50 }
 0x34e   : > { %vm641_vm12 = vmor %vm639_vm11, %vm640_vm10 }
 0x34f   : > { %v636_v52 = vsub.f32 1.0, %v635_v51 }
 0x351   : > { %v637_v54 = vmul.f32 %v1167_v50, %v636_v52 }
 0x353   : > { %v638_v56 = vadd.f32 %v1167_v50, %v637_v54 }
 0x355   : > { %v642_v58 = vsel %vm641_vm12, %v1167_v50, %v638_v56 }
 0x356   : > { %v647_v59 = vsel %vm644_vm13, %v646_v57, %v642_v58 }
 0x357   : > { %v650_v60 = vperm.slane %v647_v59, 1  ;;  %v649_v61 = vperm.slane %v647_v59, 0  ;;  %v651_v0 = vperm.slane %v647_v59, 2  ;;  %v654_v1 = vperm.slane %v647_v59, 5 }
 0x358   : > { %v653_v7 = vperm.slane %v647_v59, 4  ;;  %v655_v9 = vperm.slane %v647_v59, 6  ;;  %v652_v12 = vperm.slane %v647_v59, 3 }
 0x359   : > { %v666_v62 = vmul.f32 %v1520_v5, %v650_v60  ;;  %v665_v63 = vmul.f32 %v1522_v6, %v649_v61  ;;  %v667_v2 = vmul.f32 %v1530_v17, %v651_v0  ;;  %v670_v4 = vmul.f32 %v1159_v22, %v654_v1 }
 0x35a   : > { %v669_v10 = vmul.f32 %v1536_v23, %v653_v7  ;;  %v671_v11 = vmul.f32 %v1165_v25, %v655_v9  ;;  %v668_v5 = vmul.f32 %v1528_v16, %v652_v12  ;;  %v656_v6 = vperm.slane %v647_v59, 7 }
 0x35b   : > { %702 = vperm.xlu0 %1130, %v666_v62   ;;  %675 = vperm.xlu1 %1131, %v665_v63  }
 0x35c   : > { %v672_v13 = vmul.f32 %v1539_v24, %v656_v6 }
 0x363   : > { %729 = vperm.xlu0 %1130, %v667_v2   ;;  %810 = vperm.xlu1 %1131, %v670_v4  }
 0x36b   : > { %783 = vperm.xlu0 %1130, %v669_v10   ;;  %837 = vperm.xlu1 %1131, %v671_v11  }
 0x373   : > { %756 = vperm.xlu0 %1130, %v668_v5  }
 0x37b   : > { %864 = vperm.xlu0 %1130, %v672_v13  }
 0x3cd   : > { %v703_v18 = vpop.permute.xlu0 %702  ;;  %v676_v17 = vpop.permute.xlu1 %675 }
 0x3ce   : > { %v704_v19 = vperm.slane %v703_v18, %v1502_v34  ;;  %v677_v21 = vperm.slane %v676_v17, %v1502_v34 }
 0x3d0   : > { %1041 = vmatmul.msk.f32.vlgmr.msrb.gmra.mxu1 %vm538_vm9, %v677_v21  ;;  %1042 = vmatmul.msk.f32.vlgmr.msrb.gmra.mxu2 %vm538_vm9, %v704_v19 }
 0x3d1   : > { %884 = vmatpush.msrb.mxu2 %v1468_v14  ;;  %857 = vmatpush.msrb.mxu1 %v1453_v8 }
 0x3d5   : > { %v730_v16 = vpop.permute.xlu0 %729  ;;  %v811_v22 = vpop.permute.xlu1 %810 }
 0x3d6   : > { %v731_v15 = vperm.slane %v730_v16, %v1502_v34  ;;  %v812_v24 = vperm.slane %v811_v22, %v1502_v34 }
 0x3d8   : > { %1043 = vmatmul.msk.f32.vlgmr.msrb.gmra.mxu3 %vm538_vm9, %v731_v15 }
 0x3dd   : > { %v784_v23 = vpop.permute.xlu0 %783  ;;  %v838_v8 = vpop.permute.xlu1 %837 }
 0x3de   : > { %v785_v25 = vperm.slane %v784_v23, %v1502_v34  ;;  %v839_v28 = vperm.slane %v838_v8, %v1502_v34 }
 0x3e0   : > { %1045 = vmatmul.msk.f32.vlgmr.msra.gmra.mxu2 %vm538_vm9, %v785_v25  ;;  %1046 = vmatmul.msk.f32.vlgmr.msra.gmra.mxu3 %vm538_vm9, %v812_v24 }
 0x3e5   : > { %v757_v26 = vpop.permute.xlu0 %756 }
 0x3e6   : > { %v758_v14 = vperm.slane %v757_v26, %v1502_v34 }
 0x3e8   : > { %1044 = vmatmul.msk.f32.vlgmr.msra.gmra.mxu1 %vm538_vm9, %v758_v14 }
 0x3ed   : > { %v865_v27 = vpop.permute.xlu0 %864 }
 0x3ee   : > { %v866_v20 = vperm.slane %v865_v27, %v1502_v34 }
 0x3f0   : > { %1047 = vmatmul.msk.f32.vlgmr.msrb.gmra.mxu1 %vm538_vm9, %v839_v28  ;;  %1048 = vmatmul.msk.f32.vlgmr.msrb.gmra.mxu2 %vm538_vm9, %v866_v20 }
 0x44d   : > { %v697_v29 = vpop.f32.mrf.mxu1 }
 0x453   : > { %v724_v30 = vpop.f32.mrf.mxu2 }
 0x454   : > { %v897_v33 = vrot.slane %v724_v30, 7 }
 0x456   : > { %v898_v38 = vsel %vm523_vm2, %v897_v33, %v697_v29 }
 0x45b   : > { %v751_v31 = vpop.f32.mrf.mxu3 }
 0x45c   : > { %v899_v35 = vrot.slane %v751_v31, 6 }
 0x45e   : > { %v900_v39 = vsel %vm525_vm3, %v899_v35, %v898_v38 }
 0x463   : > { %v805_v37 = vpop.f32.mrf.mxu2  ;;  %v832_v42 = vpop.f32.mrf.mxu3 }
 0x464   : > { %v903_v41 = vrot.slane %v805_v37, 4  ;;  %v905_v44 = vrot.slane %v832_v42, 3 }
 0x465   : > { %v778_v32 = vpop.f32.mrf.mxu1 }
 0x466   : > { %v901_v36 = vrot.slane %v778_v32, 5 }
 0x468   : > { %v902_v34 = vsel %vm527_vm4, %v901_v36, %v900_v39 }
 0x469   : > { %v904_v3 = vsel %vm529_vm5, %v903_v41, %v902_v34 }
 0x46a   : > { %v906_v46 = vsel %vm531_vm6, %v905_v44, %v904_v3 }
 0x46d   : > { %v859_v40 = vpop.f32.mrf.mxu1 }
 0x46e   : > { %v907_v43 = vrot.slane %v859_v40, 2 }
 0x470   : > { %v908_v48 = vsel %vm533_vm7, %v907_v43, %v906_v46 }
 0x473   : > { %v886_v45 = vpop.f32.mrf.mxu2 }
 0x474   : > { %v909_v47 = vrot.slane %v886_v45, 1 }
 0x476   : > { %v910_v49 = vsel %vm535_vm8, %v909_v47, %v908_v48 }
 0x477   : > { %912 = vst.msk [vmem:[%s274_s15] sm:$0xff] %vm296_vm0, %v910_v49 }
 0x478   : > { %1255 = shalt.err (!%p1252_p12)
}
 0x479   : > { %1072 = dma.vmem_to_hbm [thread:$0]  (%p1403_p3), %s927_s24, 128, %s929_s22, %s914_s29  }
 0x47a PF: > { %s940_s28 = sand.u32 1, %s1286_s18   ;;  %p1637_p13 = scmp.ge.s32.totalorder %s1298_s21, 2 }
 0x47b   : > { %s941_s23 = scalar_lea.sflag [#allocation4], %s940_s28 }
 0x47c   : > { %p1083_p0 = pnand %p1637_p13, %p1369_p6 }
 0x47e   : > { %p1084_p5 = pneg %p1083_p0 }
 0x480   : > { %1281 = dma.done.wait (%p1084_p5), %s941_s23, 128  }
 0x481   : > { %1283 = vsyncadd (%p1084_p5), %s941_s23, 4294967168  ;;  %p19_p7 = scmp.ge.s32.totalorder %s1387_s7, 4   ;;  %s1638_s18 = smov %s1290_s19 }
 0x482   : > { %s1639_s19 = smov %s1294_s20  ;;  %s1640_s20 = smov %s1399_s12 }
 0x483   : > { %s1641_s21 = smov %s1387_s7  ;;  %21 = sbr.rel (!%p19_p7) target bundleno = 6 (0x6), region = 92 }
 0x488   :  { %947 = vsyncpa [#allocation3], 1 }
 0x489   :  { %949 = vsyncpa [#allocation3 + $0x1], 1 }
 0x48a   :  { %950 = vsyncpa [#allocation6], 1 }
 0x48b   :  { %951 = vsyncpa [#allocation4], 1 }
 0x48c   :  { %953 = vsyncpa [#allocation4 + $0x1], 1 }

</bundles_post_ra>
